<compile_context>
chip_gen: v6e
topology: v6e:2x2x1
jax: 0.10.0
libtpu: 0.0.40
codegen_flags: <defaults>
</compile_context>

<pallas_src>
import functools

import jax
import jax.numpy as jnp
from jax.experimental import pallas as pl
from jax.experimental.pallas import tpu as pltpu

NODE_TYPES = ["adr", "dp", "drug", "disease", "gene"]
NODE_IDX = {t: i for i, t in enumerate(NODE_TYPES)}
# Every node type is the destination of exactly one edge type.
EDGE_TYPES = [
    ("drug", "to", "adr"),
    ("adr", "to", "drug"),
    ("disease", "to", "dp"),
    ("dp", "to", "disease"),
    ("gene", "to", "gene"),
]
EDGE_FOR_DST = {NODE_IDX[dst]: (NODE_IDX[src], (src, rel, dst))
                for (src, rel, dst) in EDGE_TYPES}
SRC_OF_DST = tuple(EDGE_FOR_DST[t][0] for t in range(len(NODE_TYPES)))

NUM_LAYERS = 3            # conv1, conv2 (relu), conv4 (no relu)
LANE = 128
SUBLANE = 8
BF16_ROWS = 16            # bf16 packs 16 rows per sublane group

_DECODER_TYPES = {
    1: ("drug", "adr"),
    2: ("gene", "drug"),
    3: ("disease", "dp"),
    4: ("gene", "disease"),
    5: ("gene", "gene"),
}

_VMEM = pl.BlockSpec(memory_space=pltpu.MemorySpace.VMEM)


def _round_up(x, m):
    return (x + m - 1) // m * m


# ---------------------------------------------------------------------------
# Single fused Pallas kernel: all layers, all edge types, decoder gather+cosine
# ---------------------------------------------------------------------------
def _fused_hetero_gnn_kernel(h0_ref, adj_ref, wcat_ref, bias_ref,
                             sela_ref, selb_ref, sim_ref, *,
                             src_of_dst, num_layers, src_t, dst_t, eps):
    num_types = len(src_of_dst)

    # Activations stay resident across layers (no HBM round trips).
    h = [h0_ref[t].astype(jnp.bfloat16) for t in range(num_types)]

    for layer in range(num_layers):
        apply_relu = layer < num_layers - 1
        new_h = []
        for t in range(num_types):
            s = src_of_dst[t]
            w_idx = layer * num_types + t
            # Neighbor sum as dense adjacency matmul (bf16 MXU, f32 acc).
            # adj columns for padded nodes are zero, so padded rows stay inert.
            agg = jnp.dot(adj_ref[t], h[s], preferred_element_type=jnp.float32)
            # Fused GraphConv: [agg | x_dst] @ [[W_rel];[W_root]]  (one K=2C pass)
            x_cat = jnp.concatenate([agg.astype(jnp.bfloat16), h[t]], axis=-1)
            out = jnp.dot(x_cat, wcat_ref[w_idx],
                          preferred_element_type=jnp.float32)
            out = out + bias_ref[w_idx]                # (1, C_pad) broadcast, f32
            if apply_relu:
                out = jnp.maximum(out, 0.0)            # f32 epilogue (v5e-safe)
            new_h.append(out)
        # to_hetero(aggr='sum'): each type is dst of exactly one edge type,
        # so the cross-edge-type sum is the identity here.
        if layer < num_layers - 1:
            h = [v.astype(jnp.bfloat16) for v in new_h]
        else:
            h = new_h                                  # keep f32 for the decoder

    # --- fused EdgeDecoder (edges-along-lanes layout) ------------------------
    # Row gather expressed as a one-hot matmul kept in f32 -> exact selection.
    z_src = h[src_t]                                   # [N_pad, C_pad] f32
    z_dst = h[dst_t]
    sel_a = sela_ref[...].astype(jnp.float32)          # [N_pad, E_lane]
    sel_b = selb_ref[...].astype(jnp.float32)
    za = jnp.dot(z_src.T, sel_a, preferred_element_type=jnp.float32)  # [C, E_lane]
    zb = jnp.dot(z_dst.T, sel_b, preferred_element_type=jnp.float32)

    dot = jnp.sum(za * zb, axis=0, keepdims=True)      # [1, E_lane] (sublane reduce)
    na = jnp.sqrt(jnp.sum(za * za, axis=0, keepdims=True))
    nb = jnp.sqrt(jnp.sum(zb * zb, axis=0, keepdims=True))
    # matches torch cosine_similarity: clamp each norm to eps
    denom = jnp.maximum(na, eps) * jnp.maximum(nb, eps)
    sim = dot * pl.reciprocal(denom, approx=True)      # EUP slot, not VPU

    # lane-dense [8, E_lane] slab: unmasked stores, no 128x duplication
    sim_ref[...] = jnp.broadcast_to(sim, sim_ref.shape)


# ---------------------------------------------------------------------------
# Parameter initialization (deterministic, synthetic, padded / packed / bf16)
# ---------------------------------------------------------------------------
def init_params(key, num_nodes_dict, hidden_channels):
    T = len(NODE_TYPES)
    c_pad = _round_up(hidden_channels, LANE)
    pad_c = c_pad - hidden_channels

    params = {"emb": {}}
    key, *ek = jax.random.split(key, 1 + T)
    for t, k in zip(NODE_TYPES, ek):
        e = jax.random.normal(k, (num_nodes_dict[t], hidden_channels),
                              dtype=jnp.float32)
        params["emb"][t] = jnp.pad(e, ((0, 0), (0, pad_c)))

    key, k1, k2, k3 = jax.random.split(key, 4)
    w_rel = 0.1 * jax.random.normal(
        k1, (NUM_LAYERS * T, hidden_channels, hidden_channels), jnp.float32)
    w_root = 0.1 * jax.random.normal(
        k2, (NUM_LAYERS * T, hidden_channels, hidden_channels), jnp.float32)
    bias = 0.1 * jax.random.normal(
        k3, (NUM_LAYERS * T, 1, hidden_channels), jnp.float32)
    w_rel = jnp.pad(w_rel, ((0, 0), (0, pad_c), (0, pad_c)))
    w_root = jnp.pad(w_root, ((0, 0), (0, pad_c), (0, pad_c)))
    # Pack [W_rel; W_root] along K and pre-cast to bf16 on the host.
    params["w_cat"] = jnp.concatenate([w_rel, w_root], axis=1).astype(jnp.bfloat16)
    params["bias"] = jnp.pad(bias, ((0, 0), (0, 0), (0, pad_c)))       # f32

    # EdgeDecoder.linear (unused: forward() uses apply_linear=False default).
    key, k1, k2 = jax.random.split(key, 3)
    params["decoder_linear"] = {
        "w": jax.random.normal(k1, (1, 1), jnp.float32),
        "b": jax.random.normal(k2, (1,), jnp.float32),
    }
    return params


# ---------------------------------------------------------------------------
# Forward: JAX glue builds padded stacked operands, one pallas_call does it all
# ---------------------------------------------------------------------------
def hetero_gnn_forward(params, x_dict, edge_index_dict, edge_label_index, type_):
    T = len(NODE_TYPES)
    c_pad = params["w_cat"].shape[-1]
    n_per_type = {t: x_dict[t].shape[0] for t in NODE_TYPES}
    # 16-row rounding: bf16 packs 16 rows per sublane group.
    n_pad = _round_up(max(max(n_per_type.values()), BF16_ROWS), BF16_ROWS)

    # Embedding lookup (data-dependent gather kept in JAX glue), stack + pad.
    h0 = []
    for t in NODE_TYPES:
        e = params["emb"][t][x_dict[t]]
        e = jnp.pad(e, ((0, n_pad - e.shape[0]), (0, 0)))
        h0.append(e)
    h0 = jnp.stack(h0)                                       # [T, n_pad, c_pad] f32

    # Dense adjacency per dst type: A[t, dst, src] = # edges src -> dst.
    # Counts are small integers -> exact in bf16; padded columns stay zero.
    adj = []
    for t in range(T):
        _, et = EDGE_FOR_DST[t]
        ei = edge_index_dict[et]
        a = jnp.zeros((n_pad, n_pad), jnp.float32).at[ei[1], ei[0]].add(1.0)
        adj.append(a.astype(jnp.bfloat16))
    adj = jnp.stack(adj)                                     # [T, n_pad, n_pad] bf16

    # Decoder row-selection one-hots, edges-along-lanes layout, bf16 in HBM.
    src_key, dst_key = _DECODER_TYPES[type_]
    src_t, dst_t = NODE_IDX[src_key], NODE_IDX[dst_key]
    row0, row1 = edge_label_index[0], edge_label_index[1]
    e = row0.shape[0]
    e_lane = _round_up(max(e, LANE), LANE)
    sel_a = jnp.pad(jax.nn.one_hot(row0, n_pad, dtype=jnp.bfloat16, axis=0),
                    ((0, 0), (0, e_lane - e)))               # [n_pad, e_lane]
    sel_b = jnp.pad(jax.nn.one_hot(row1, n_pad, dtype=jnp.bfloat16, axis=0),
                    ((0, 0), (0, e_lane - e)))

    kern = functools.partial(
        _fused_hetero_gnn_kernel,
        src_of_dst=SRC_OF_DST, num_layers=NUM_LAYERS,
        src_t=src_t, dst_t=dst_t, eps=1e-6)

    in_bytes = (h0.size * 4 + adj.size * 2 + params["w_cat"].size * 2
                + params["bias"].size * 4 + sel_a.size * 2 + sel_b.size * 2)
    out_bytes = SUBLANE * e_lane * 4
    flops = (NUM_LAYERS * T * (2 * n_pad * n_pad * c_pad
                               + 2 * n_pad * (2 * c_pad) * c_pad)
             + 2 * 2 * n_pad * c_pad * e_lane)
    cost = pl.CostEstimate(flops=flops, transcendentals=3 * e_lane,
                           bytes_accessed=in_bytes + out_bytes)
    vmem_budget = min(max(4 * (in_bytes + out_bytes) + (8 << 20), 16 << 20),
                      64 << 20)

    sim_slab = pl.pallas_call(
        kern,
        out_shape=jax.ShapeDtypeStruct((SUBLANE, e_lane), jnp.float32),
        in_specs=[_VMEM] * 6,
        out_specs=_VMEM,
        compiler_params=pltpu.CompilerParams(vmem_limit_bytes=vmem_budget),
        cost_estimate=cost,
    )(h0, adj, params["w_cat"], params["bias"], sel_a, sel_b)

    # TODO(synk): apply_linear=True branch (Linear(1,1) on sim) not exercised,
    # matching the reference forward which uses the default apply_linear=False.
    return sim_slab[0, :e]


model_forward = jax.jit(hetero_gnn_forward, static_argnames=("type_",))


# ---------------------------------------------------------------------------
if __name__ == "__main__":
    key = jax.random.PRNGKey(0)
    hidden_channels = 32
    num_nodes = 16
    num_edges = 24
    num_label_edges = 8

    num_nodes_dict = {t: num_nodes for t in NODE_TYPES}
    params = init_params(key, num_nodes_dict, hidden_channels)

    # x_dict: node index tensors fed to the Embedding layers
    x_dict = {t: jnp.arange(num_nodes, dtype=jnp.int32) for t in NODE_TYPES}

    # random edge_index per edge type, shape [2, num_edges]
    edge_index_dict = {}
    k = key
    for et in EDGE_TYPES:
        k, k1, k2 = jax.random.split(k, 3)
        src_idx = jax.random.randint(k1, (num_edges,), 0, num_nodes, dtype=jnp.int32)
        dst_idx = jax.random.randint(k2, (num_edges,), 0, num_nodes, dtype=jnp.int32)
        edge_index_dict[et] = jnp.stack([src_idx, dst_idx])

    # edge_label_index for decoder type=1: (drug index, adr index) pairs
    k, k1, k2 = jax.random.split(k, 3)
    edge_label_index = jnp.stack([
        jax.random.randint(k1, (num_label_edges,), 0, num_nodes, dtype=jnp.int32),
        jax.random.randint(k2, (num_label_edges,), 0, num_nodes, dtype=jnp.int32),
    ])

    sim = model_forward(params, x_dict, edge_index_dict, edge_label_index, type_=1)
    sim = jax.block_until_ready(sim)
    assert sim.shape == (num_label_edges,)
    assert bool(jnp.all(jnp.isfinite(sim)))
    print("KERNEL_OK")
</pallas_src>

<mosaic_0001>
module attributes {stable_mosaic.version = 11 : i64} {
  func.func private @main(%arg0: i32) attributes {dimension_semantics = [#tpu.dimension_semantics<core_parallel>], iteration_bounds = array<i64: 2>, tpu.core_type = #tpu.core_type<sc_scalar_subcore>, window_params = []} {
    return
  }
}

module attributes {stable_mosaic.version = 11 : i64} {
  func.func private @main(%arg0: i32) attributes {dimension_semantics = [#tpu.dimension_semantics<core_parallel>], iteration_bounds = array<i64: 2>, tpu.core_type = #tpu.core_type<sc_scalar_subcore>, window_params = []} {
    return
  }
}

module attributes {stable_mosaic.version = 11 : i64} {
  func.func @_fused_hetero_gnn_kernel(%arg0: memref<5x16x128xf32, #tpu.memory_space<vmem>>, %arg1: memref<5x16x16xbf16, #tpu.memory_space<vmem>>, %arg2: memref<15x256x128xbf16, #tpu.memory_space<vmem>>, %arg3: memref<15x1x128xf32, #tpu.memory_space<vmem>>, %arg4: memref<16x128xbf16, #tpu.memory_space<vmem>>, %arg5: memref<16x128xbf16, #tpu.memory_space<vmem>>, %arg6: memref<8x128xf32, #tpu.memory_space<vmem>>) attributes {dimension_semantics = [], scalar_prefetch = 0 : i64, scratch_operands = 0 : i64, tpu.core_type = #tpu.core_type<tc>} {
    %c0 = arith.constant 0 : index
    %c0_0 = arith.constant 0 : index
    %c0_1 = arith.constant 0 : index
    %0 = vector.load %arg0[%c0, %c0_0, %c0_1] : memref<5x16x128xf32, #tpu.memory_space<vmem>>, vector<1x16x128xf32>
    %1 = vector.shape_cast %0 : vector<1x16x128xf32> to vector<16x128xf32>
    %2 = arith.truncf %1 : vector<16x128xf32> to vector<16x128xbf16>
    %c2 = arith.constant 2 : index
    %c0_2 = arith.constant 0 : index
    %c0_3 = arith.constant 0 : index
    %3 = vector.load %arg0[%c2, %c0_2, %c0_3] : memref<5x16x128xf32, #tpu.memory_space<vmem>>, vector<1x16x128xf32>
    %4 = vector.shape_cast %3 : vector<1x16x128xf32> to vector<16x128xf32>
    %5 = arith.truncf %4 : vector<16x128xf32> to vector<16x128xbf16>
    %c0_4 = arith.constant 0 : index
    %c0_5 = arith.constant 0 : index
    %c0_6 = arith.constant 0 : index
    %6 = vector.load %arg1[%c0_4, %c0_5, %c0_6] : memref<5x16x16xbf16, #tpu.memory_space<vmem>>, vector<1x16x16xbf16>
    %7 = vector.shape_cast %6 : vector<1x16x16xbf16> to vector<16x16xbf16>
    %cst = arith.constant dense<0.000000e+00> : vector<16x128xf32>
    %8 = tpu.matmul %7, %5, %cst {dimension_numbers = #tpu.dot_dimension_numbers<[1], [0], [0], [1], [0, 0, 1, 1], [], []>} : vector<16x16xbf16>, vector<16x128xbf16>, vector<16x128xf32> -> vector<16x128xf32>
    %9 = arith.truncf %8 : vector<16x128xf32> to vector<16x128xbf16>
    %10 = tpu.concatenate %9, %2 in 1 : vector<16x128xbf16>, vector<16x128xbf16> -> vector<16x256xbf16>
    %c0_7 = arith.constant 0 : index
    %c0_8 = arith.constant 0 : index
    %c0_9 = arith.constant 0 : index
    %11 = vector.load %arg2[%c0_7, %c0_8, %c0_9] : memref<15x256x128xbf16, #tpu.memory_space<vmem>>, vector<1x256x128xbf16>
    %12 = vector.shape_cast %11 : vector<1x256x128xbf16> to vector<256x128xbf16>
    %cst_10 = arith.constant dense<0.000000e+00> : vector<16x128xf32>
    %13 = tpu.matmul %10, %12, %cst_10 {dimension_numbers = #tpu.dot_dimension_numbers<[1], [0], [0], [1], [0, 0, 1, 1], [], []>} : vector<16x256xbf16>, vector<256x128xbf16>, vector<16x128xf32> -> vector<16x128xf32>
    %c0_11 = arith.constant 0 : index
    %c0_12 = arith.constant 0 : index
    %c0_13 = arith.constant 0 : index
    %14 = vector.load %arg3[%c0_11, %c0_12, %c0_13] : memref<15x1x128xf32, #tpu.memory_space<vmem>>, vector<1x1x128xf32>
    %15 = vector.shape_cast %14 : vector<1x1x128xf32> to vector<1x128xf32>
    %16 = vector.broadcast %15 : vector<1x128xf32> to vector<16x128xf32>
    %17 = arith.addf %13, %16 : vector<16x128xf32>
    %cst_14 = arith.constant 0.000000e+00 : f32
    %18 = vector.broadcast %cst_14 : f32 to vector<16x128xf32>
    %19 = arith.maximumf %17, %18 : vector<16x128xf32>
    %c2_15 = arith.constant 2 : index
    %c0_16 = arith.constant 0 : index
    %c0_17 = arith.constant 0 : index
    %20 = vector.load %arg1[%c2_15, %c0_16, %c0_17] : memref<5x16x16xbf16, #tpu.memory_space<vmem>>, vector<1x16x16xbf16>
    %21 = vector.shape_cast %20 : vector<1x16x16xbf16> to vector<16x16xbf16>
    %cst_18 = arith.constant dense<0.000000e+00> : vector<16x128xf32>
    %22 = tpu.matmul %21, %2, %cst_18 {dimension_numbers = #tpu.dot_dimension_numbers<[1], [0], [0], [1], [0, 0, 1, 1], [], []>} : vector<16x16xbf16>, vector<16x128xbf16>, vector<16x128xf32> -> vector<16x128xf32>
    %23 = arith.truncf %22 : vector<16x128xf32> to vector<16x128xbf16>
    %24 = tpu.concatenate %23, %5 in 1 : vector<16x128xbf16>, vector<16x128xbf16> -> vector<16x256xbf16>
    %c2_19 = arith.constant 2 : index
    %c0_20 = arith.constant 0 : index
    %c0_21 = arith.constant 0 : index
    %25 = vector.load %arg2[%c2_19, %c0_20, %c0_21] : memref<15x256x128xbf16, #tpu.memory_space<vmem>>, vector<1x256x128xbf16>
    %26 = vector.shape_cast %25 : vector<1x256x128xbf16> to vector<256x128xbf16>
    %cst_22 = arith.constant dense<0.000000e+00> : vector<16x128xf32>
    %27 = tpu.matmul %24, %26, %cst_22 {dimension_numbers = #tpu.dot_dimension_numbers<[1], [0], [0], [1], [0, 0, 1, 1], [], []>} : vector<16x256xbf16>, vector<256x128xbf16>, vector<16x128xf32> -> vector<16x128xf32>
    %c2_23 = arith.constant 2 : index
    %c0_24 = arith.constant 0 : index
    %c0_25 = arith.constant 0 : index
    %28 = vector.load %arg3[%c2_23, %c0_24, %c0_25] : memref<15x1x128xf32, #tpu.memory_space<vmem>>, vector<1x1x128xf32>
    %29 = vector.shape_cast %28 : vector<1x1x128xf32> to vector<1x128xf32>
    %30 = vector.broadcast %29 : vector<1x128xf32> to vector<16x128xf32>
    %31 = arith.addf %27, %30 : vector<16x128xf32>
    %cst_26 = arith.constant 0.000000e+00 : f32
    %32 = vector.broadcast %cst_26 : f32 to vector<16x128xf32>
    %33 = arith.maximumf %31, %32 : vector<16x128xf32>
    %34 = arith.truncf %19 : vector<16x128xf32> to vector<16x128xbf16>
    %35 = arith.truncf %33 : vector<16x128xf32> to vector<16x128xbf16>
    %c0_27 = arith.constant 0 : index
    %c0_28 = arith.constant 0 : index
    %c0_29 = arith.constant 0 : index
    %36 = vector.load %arg1[%c0_27, %c0_28, %c0_29] : memref<5x16x16xbf16, #tpu.memory_space<vmem>>, vector<1x16x16xbf16>
    %37 = vector.shape_cast %36 : vector<1x16x16xbf16> to vector<16x16xbf16>
    %cst_30 = arith.constant dense<0.000000e+00> : vector<16x128xf32>
    %38 = tpu.matmul %37, %35, %cst_30 {dimension_numbers = #tpu.dot_dimension_numbers<[1], [0], [0], [1], [0, 0, 1, 1], [], []>} : vector<16x16xbf16>, vector<16x128xbf16>, vector<16x128xf32> -> vector<16x128xf32>
    %39 = arith.truncf %38 : vector<16x128xf32> to vector<16x128xbf16>
    %40 = tpu.concatenate %39, %34 in 1 : vector<16x128xbf16>, vector<16x128xbf16> -> vector<16x256xbf16>
    %c5 = arith.constant 5 : index
    %c0_31 = arith.constant 0 : index
    %c0_32 = arith.constant 0 : index
    %41 = vector.load %arg2[%c5, %c0_31, %c0_32] : memref<15x256x128xbf16, #tpu.memory_space<vmem>>, vector<1x256x128xbf16>
    %42 = vector.shape_cast %41 : vector<1x256x128xbf16> to vector<256x128xbf16>
    %cst_33 = arith.constant dense<0.000000e+00> : vector<16x128xf32>
    %43 = tpu.matmul %40, %42, %cst_33 {dimension_numbers = #tpu.dot_dimension_numbers<[1], [0], [0], [1], [0, 0, 1, 1], [], []>} : vector<16x256xbf16>, vector<256x128xbf16>, vector<16x128xf32> -> vector<16x128xf32>
    %c5_34 = arith.constant 5 : index
    %c0_35 = arith.constant 0 : index
    %c0_36 = arith.constant 0 : index
    %44 = vector.load %arg3[%c5_34, %c0_35, %c0_36] : memref<15x1x128xf32, #tpu.memory_space<vmem>>, vector<1x1x128xf32>
    %45 = vector.shape_cast %44 : vector<1x1x128xf32> to vector<1x128xf32>
    %46 = vector.broadcast %45 : vector<1x128xf32> to vector<16x128xf32>
    %47 = arith.addf %43, %46 : vector<16x128xf32>
    %cst_37 = arith.constant 0.000000e+00 : f32
    %48 = vector.broadcast %cst_37 : f32 to vector<16x128xf32>
    %49 = arith.maximumf %47, %48 : vector<16x128xf32>
    %c2_38 = arith.constant 2 : index
    %c0_39 = arith.constant 0 : index
    %c0_40 = arith.constant 0 : index
    %50 = vector.load %arg1[%c2_38, %c0_39, %c0_40] : memref<5x16x16xbf16, #tpu.memory_space<vmem>>, vector<1x16x16xbf16>
    %51 = vector.shape_cast %50 : vector<1x16x16xbf16> to vector<16x16xbf16>
    %cst_41 = arith.constant dense<0.000000e+00> : vector<16x128xf32>
    %52 = tpu.matmul %51, %34, %cst_41 {dimension_numbers = #tpu.dot_dimension_numbers<[1], [0], [0], [1], [0, 0, 1, 1], [], []>} : vector<16x16xbf16>, vector<16x128xbf16>, vector<16x128xf32> -> vector<16x128xf32>
    %53 = arith.truncf %52 : vector<16x128xf32> to vector<16x128xbf16>
    %54 = tpu.concatenate %53, %35 in 1 : vector<16x128xbf16>, vector<16x128xbf16> -> vector<16x256xbf16>
    %c7 = arith.constant 7 : index
    %c0_42 = arith.constant 0 : index
    %c0_43 = arith.constant 0 : index
    %55 = vector.load %arg2[%c7, %c0_42, %c0_43] : memref<15x256x128xbf16, #tpu.memory_space<vmem>>, vector<1x256x128xbf16>
    %56 = vector.shape_cast %55 : vector<1x256x128xbf16> to vector<256x128xbf16>
    %cst_44 = arith.constant dense<0.000000e+00> : vector<16x128xf32>
    %57 = tpu.matmul %54, %56, %cst_44 {dimension_numbers = #tpu.dot_dimension_numbers<[1], [0], [0], [1], [0, 0, 1, 1], [], []>} : vector<16x256xbf16>, vector<256x128xbf16>, vector<16x128xf32> -> vector<16x128xf32>
    %c7_45 = arith.constant 7 : index
    %c0_46 = arith.constant 0 : index
    %c0_47 = arith.constant 0 : index
    %58 = vector.load %arg3[%c7_45, %c0_46, %c0_47] : memref<15x1x128xf32, #tpu.memory_space<vmem>>, vector<1x1x128xf32>
    %59 = vector.shape_cast %58 : vector<1x1x128xf32> to vector<1x128xf32>
    %60 = vector.broadcast %59 : vector<1x128xf32> to vector<16x128xf32>
    %61 = arith.addf %57, %60 : vector<16x128xf32>
    %cst_48 = arith.constant 0.000000e+00 : f32
    %62 = vector.broadcast %cst_48 : f32 to vector<16x128xf32>
    %63 = arith.maximumf %61, %62 : vector<16x128xf32>
    %64 = arith.truncf %49 : vector<16x128xf32> to vector<16x128xbf16>
    %65 = arith.truncf %63 : vector<16x128xf32> to vector<16x128xbf16>
    %c0_49 = arith.constant 0 : index
    %c0_50 = arith.constant 0 : index
    %c0_51 = arith.constant 0 : index
    %66 = vector.load %arg1[%c0_49, %c0_50, %c0_51] : memref<5x16x16xbf16, #tpu.memory_space<vmem>>, vector<1x16x16xbf16>
    %67 = vector.shape_cast %66 : vector<1x16x16xbf16> to vector<16x16xbf16>
    %cst_52 = arith.constant dense<0.000000e+00> : vector<16x128xf32>
    %68 = tpu.matmul %67, %65, %cst_52 {dimension_numbers = #tpu.dot_dimension_numbers<[1], [0], [0], [1], [0, 0, 1, 1], [], []>} : vector<16x16xbf16>, vector<16x128xbf16>, vector<16x128xf32> -> vector<16x128xf32>
    %69 = arith.truncf %68 : vector<16x128xf32> to vector<16x128xbf16>
    %70 = tpu.concatenate %69, %64 in 1 : vector<16x128xbf16>, vector<16x128xbf16> -> vector<16x256xbf16>
    %c10 = arith.constant 10 : index
    %c0_53 = arith.constant 0 : index
    %c0_54 = arith.constant 0 : index
    %71 = vector.load %arg2[%c10, %c0_53, %c0_54] : memref<15x256x128xbf16, #tpu.memory_space<vmem>>, vector<1x256x128xbf16>
    %72 = vector.shape_cast %71 : vector<1x256x128xbf16> to vector<256x128xbf16>
    %cst_55 = arith.constant dense<0.000000e+00> : vector<16x128xf32>
    %73 = tpu.matmul %70, %72, %cst_55 {dimension_numbers = #tpu.dot_dimension_numbers<[1], [0], [0], [1], [0, 0, 1, 1], [], []>} : vector<16x256xbf16>, vector<256x128xbf16>, vector<16x128xf32> -> vector<16x128xf32>
    %c10_56 = arith.constant 10 : index
    %c0_57 = arith.constant 0 : index
    %c0_58 = arith.constant 0 : index
    %74 = vector.load %arg3[%c10_56, %c0_57, %c0_58] : memref<15x1x128xf32, #tpu.memory_space<vmem>>, vector<1x1x128xf32>
    %75 = vector.shape_cast %74 : vector<1x1x128xf32> to vector<1x128xf32>
    %76 = vector.broadcast %75 : vector<1x128xf32> to vector<16x128xf32>
    %77 = arith.addf %73, %76 : vector<16x128xf32>
    %c2_59 = arith.constant 2 : index
    %c0_60 = arith.constant 0 : index
    %c0_61 = arith.constant 0 : index
    %78 = vector.load %arg1[%c2_59, %c0_60, %c0_61] : memref<5x16x16xbf16, #tpu.memory_space<vmem>>, vector<1x16x16xbf16>
    %79 = vector.shape_cast %78 : vector<1x16x16xbf16> to vector<16x16xbf16>
    %cst_62 = arith.constant dense<0.000000e+00> : vector<16x128xf32>
    %80 = tpu.matmul %79, %64, %cst_62 {dimension_numbers = #tpu.dot_dimension_numbers<[1], [0], [0], [1], [0, 0, 1, 1], [], []>} : vector<16x16xbf16>, vector<16x128xbf16>, vector<16x128xf32> -> vector<16x128xf32>
    %81 = arith.truncf %80 : vector<16x128xf32> to vector<16x128xbf16>
    %82 = tpu.concatenate %81, %65 in 1 : vector<16x128xbf16>, vector<16x128xbf16> -> vector<16x256xbf16>
    %c12 = arith.constant 12 : index
    %c0_63 = arith.constant 0 : index
    %c0_64 = arith.constant 0 : index
    %83 = vector.load %arg2[%c12, %c0_63, %c0_64] : memref<15x256x128xbf16, #tpu.memory_space<vmem>>, vector<1x256x128xbf16>
    %84 = vector.shape_cast %83 : vector<1x256x128xbf16> to vector<256x128xbf16>
    %cst_65 = arith.constant dense<0.000000e+00> : vector<16x128xf32>
    %85 = tpu.matmul %82, %84, %cst_65 {dimension_numbers = #tpu.dot_dimension_numbers<[1], [0], [0], [1], [0, 0, 1, 1], [], []>} : vector<16x256xbf16>, vector<256x128xbf16>, vector<16x128xf32> -> vector<16x128xf32>
    %c12_66 = arith.constant 12 : index
    %c0_67 = arith.constant 0 : index
    %c0_68 = arith.constant 0 : index
    %86 = vector.load %arg3[%c12_66, %c0_67, %c0_68] : memref<15x1x128xf32, #tpu.memory_space<vmem>>, vector<1x1x128xf32>
    %87 = vector.shape_cast %86 : vector<1x1x128xf32> to vector<1x128xf32>
    %88 = vector.broadcast %87 : vector<1x128xf32> to vector<16x128xf32>
    %89 = arith.addf %85, %88 : vector<16x128xf32>
    %c0_69 = arith.constant 0 : index
    %c0_70 = arith.constant 0 : index
    %90 = vector.load %arg4[%c0_69, %c0_70] : memref<16x128xbf16, #tpu.memory_space<vmem>>, vector<16x128xbf16>
    %91 = arith.extf %90 : vector<16x128xbf16> to vector<16x128xf32>
    %c0_71 = arith.constant 0 : index
    %c0_72 = arith.constant 0 : index
    %92 = vector.load %arg5[%c0_71, %c0_72] : memref<16x128xbf16, #tpu.memory_space<vmem>>, vector<16x128xbf16>
    %93 = arith.extf %92 : vector<16x128xbf16> to vector<16x128xf32>
    %94 = tpu.transpose %89, [1, 0] : vector<16x128xf32> -> vector<128x16xf32>
    %cst_73 = arith.constant dense<0.000000e+00> : vector<128x128xf32>
    %95 = tpu.matmul %94, %91, %cst_73 {dimension_numbers = #tpu.dot_dimension_numbers<[1], [0], [0], [1], [0, 0, 1, 1], [], []>} : vector<128x16xf32>, vector<16x128xf32>, vector<128x128xf32> -> vector<128x128xf32>
    %96 = tpu.transpose %77, [1, 0] : vector<16x128xf32> -> vector<128x16xf32>
    %cst_74 = arith.constant dense<0.000000e+00> : vector<128x128xf32>
    %97 = tpu.matmul %96, %93, %cst_74 {dimension_numbers = #tpu.dot_dimension_numbers<[1], [0], [0], [1], [0, 0, 1, 1], [], []>} : vector<128x16xf32>, vector<16x128xf32>, vector<128x128xf32> -> vector<128x128xf32>
    %98 = arith.mulf %95, %97 : vector<128x128xf32>
    %cst_75 = arith.constant dense<0.000000e+00> : vector<128xf32>
    %99 = vector.multi_reduction <add>, %98, %cst_75 [0] : vector<128x128xf32> to vector<128xf32>
    %100 = vector.shape_cast %99 : vector<128xf32> to vector<1x128xf32>
    %101 = arith.mulf %95, %95 : vector<128x128xf32>
    %cst_76 = arith.constant dense<0.000000e+00> : vector<128xf32>
    %102 = vector.multi_reduction <add>, %101, %cst_76 [0] : vector<128x128xf32> to vector<128xf32>
    %103 = vector.shape_cast %102 : vector<128xf32> to vector<1x128xf32>
    %104 = math.sqrt %103 : vector<1x128xf32>
    %105 = arith.mulf %97, %97 : vector<128x128xf32>
    %cst_77 = arith.constant dense<0.000000e+00> : vector<128xf32>
    %106 = vector.multi_reduction <add>, %105, %cst_77 [0] : vector<128x128xf32> to vector<128xf32>
    %107 = vector.shape_cast %106 : vector<128xf32> to vector<1x128xf32>
    %108 = math.sqrt %107 : vector<1x128xf32>
    %cst_78 = arith.constant 9.99999997E-7 : f32
    %109 = vector.broadcast %cst_78 : f32 to vector<1x128xf32>
    %110 = arith.maximumf %104, %109 : vector<1x128xf32>
    %cst_79 = arith.constant 9.99999997E-7 : f32
    %111 = vector.broadcast %cst_79 : f32 to vector<1x128xf32>
    %112 = arith.maximumf %108, %111 : vector<1x128xf32>
    %113 = arith.mulf %110, %112 : vector<1x128xf32>
    %114 = tpu.reciprocal %113 {approx = true} : vector<1x128xf32> -> vector<1x128xf32>
    %115 = arith.mulf %100, %114 : vector<1x128xf32>
    %116 = vector.shape_cast %115 : vector<1x128xf32> to vector<1x128xf32>
    %117 = vector.broadcast %116 : vector<1x128xf32> to vector<8x128xf32>
    %c0_80 = arith.constant 0 : index
    %c0_81 = arith.constant 0 : index
    %118 = vector.load %arg6[%c0_80, %c0_81] : memref<8x128xf32, #tpu.memory_space<vmem>>, vector<8x128xf32>
    tpu.vector_store %arg6[%c0_80, %c0_81], %117 {strides = array<i32>} : memref<8x128xf32, #tpu.memory_space<vmem>>, vector<8x128xf32>,
    return
  }
}

</mosaic_0001>

<bundles_post_ra>
// kernel: hetero_gnn_forward.1
= control target key start
LH: loop header
LB: loop body
LE: loop exit
PB: predicated region body
PF: predicated region fallthrough
CT: control target
= control target key end

     0   :  { %v2673_v0 = vmov 0.0   ;;  %vm2674_vm0 = vmmov 0   ;;  %vm38_vm1 = vcmask 130048   ;;  %s3164_s0 = inlined_call_operand.vmem [shape: f32[5,16,128], index: 0, kind: input, shape index: {}]   ;;  %s3165_s1 = inlined_call_operand.vmem [shape: bf16[5,16,16], index: 1, kind: input, shape index: {}]   ;;  %s3166_s2 = inlined_call_operand.vmem [shape: bf16[15,256,128], index: 2, kind: input, shape index: {}]   ;;  %s3167_s3 = inlined_call_operand.vmem [shape: f32[15,1,128], index: 3, kind: input, shape index: {}]   ;;  %s3168_s4 = inlined_call_operand.vmem [shape: bf16[16,128], index: 4, kind: input, shape index: {}]   ;;  %s3169_s5 = inlined_call_operand.vmem [shape: bf16[16,128], index: 5, kind: input, shape index: {}]   ;;  %s3170_s6 = inlined_call_operand.vmem [shape: f32[8,128], index: 6, kind: output, shape index: {}]  }
   0x1   :  { %2475 = vmatprep.subr.bf16.mxu1 %v2673_v0  ;;  %2481 = vmatprep.subr.bf16.mxu0 %v2673_v0  ;;  %v1976_v1 = vld [vmem:[%s3164_s0 + $0x20] sm:$0xff]  ;;  %v1977_v2 = vld [vmem:[%s3164_s0 + $0x28] sm:$0xff]  ;;  %v2736_v8 = vld [vmem:[%s3165_s1 + $0x10] sm:$0xff]  }
   0x2   :  { %v24_v3 = vld [vmem:[%s3164_s0] sm:$0xff]  ;;  %v30_v4 = vpack.c.bf16 %v1977_v2, %v1976_v1  ;;  %v25_v5 = vld [vmem:[%s3164_s0 + $0x8] sm:$0xff]  ;;  %2477 = vmatprep.mubr.msk.bf16.mxu1 %vm2674_vm0, %v2673_v0  ;;  %2483 = vmatprep.mubr.msk.bf16.mxu0 %vm2674_vm0, %v2673_v0  ;;  %v2571_v9 = vld [vmem:[%s3166_s2 + $0x78] sm:$0xff]  }
   0x3   :  { %v26_v6 = vpack.c.bf16 %v25_v5, %v24_v3  ;;  %v2731_v7 = vld [vmem:[%s3165_s1] sm:$0xff]   ;;  %v2572_v10 = vld [vmem:[%s3166_s2 + $0x178] sm:$0xff]   ;;  %v2575_v13 = vld [vmem:[%s3166_s2 + $0x70] sm:$0xff]  }
   0x4   :  { %2476 = vmatpush3.bf16.msra.mxu1 %v30_v4  ;;  %v2573_v11 = vld [vmem:[%s3166_s2 + $0x38] sm:$0xff]   ;;  %v2576_v14 = vld [vmem:[%s3166_s2 + $0x170] sm:$0xff]   ;;  %v2579_v17 = vld [vmem:[%s3166_s2 + $0x68] sm:$0xff]  }
   0x5   :  { %2482 = vmatpush3.bf16.msra.mxu0 %v26_v6  ;;  %2297 = vmatprep.subr.bf16.mxu1 %v2571_v9  ;;  %v2574_v12 = vld [vmem:[%s3166_s2 + $0x138] sm:$0xff]   ;;  %v2577_v15 = vld [vmem:[%s3166_s2 + $0x30] sm:$0xff]   ;;  %v2580_v18 = vld [vmem:[%s3166_s2 + $0x168] sm:$0xff]  }
   0x6   :  { %2321 = vmatprep.subr.bf16.mxu0 %v2572_v10  ;;  %v2578_v16 = vld [vmem:[%s3166_s2 + $0x130] sm:$0xff]   ;;  %v2581_v19 = vld [vmem:[%s3166_s2 + $0x28] sm:$0xff]   ;;  %v2583_v21 = vld [vmem:[%s3166_s2 + $0x60] sm:$0xff]  }
   0x7   :  { %2478 = vmatmul.mubr.msk.bf16.vlgmr.msra.gmra.mxu1 %vm38_vm1, %v2731_v7  ;;  %v2582_v20 = vld [vmem:[%s3166_s2 + $0x128] sm:$0xff]   ;;  %v2584_v22 = vld [vmem:[%s3166_s2 + $0x160] sm:$0xff]   ;;  %v2587_v25 = vld [vmem:[%s3166_s2 + $0x58] sm:$0xff]  }
   0x8   :  { %2484 = vmatmul.mubr.msk.bf16.vlgmr.msra.gmra.mxu0 %vm38_vm1, %v2736_v8  ;;  %2298 = vmatpush3.bf16.msra.mxu1 %v2573_v11  ;;  %v2585_v23 = vld [vmem:[%s3166_s2 + $0x20] sm:$0xff]   ;;  %v2588_v26 = vld [vmem:[%s3166_s2 + $0x158] sm:$0xff]   ;;  %v2591_v29 = vld [vmem:[%s3166_s2 + $0x50] sm:$0xff]  }
   0x9   :  { %251 = vmatprep.mubr.bf16.mxu1 %v26_v6  ;;  %2322 = vmatpush3.bf16.msra.mxu0 %v2574_v12  ;;  %v2586_v24 = vld [vmem:[%s3166_s2 + $0x120] sm:$0xff]   ;;  %v2589_v27 = vld [vmem:[%s3166_s2 + $0x18] sm:$0xff]   ;;  %v2592_v30 = vld [vmem:[%s3166_s2 + $0x150] sm:$0xff]  }
   0xa   :  { %484 = vmatprep.mubr.bf16.mxu0 %v30_v4  ;;  %2299 = vmatprep.subr.bf16.mxu1 %v2575_v13  ;;  %v2590_v28 = vld [vmem:[%s3166_s2 + $0x118] sm:$0xff]   ;;  %v2593_v31 = vld [vmem:[%s3166_s2 + $0x10] sm:$0xff]   ;;  %v2595_v33 = vld [vmem:[%s3166_s2 + $0x48] sm:$0xff]  }
   0xb   :  { %2323 = vmatprep.subr.bf16.mxu0 %v2576_v14  ;;  %v2594_v32 = vld [vmem:[%s3166_s2 + $0x110] sm:$0xff]   ;;  %v2596_v34 = vld [vmem:[%s3166_s2 + $0x148] sm:$0xff]   ;;  %v2599_v37 = vld [vmem:[%s3166_s2 + $0x40] sm:$0xff]  }
   0xc   :  { %2300 = vmatpush3.bf16.msra.mxu1 %v2577_v15  ;;  %v2597_v35 = vld [vmem:[%s3166_s2 + $0x8] sm:$0xff]   ;;  %v2600_v38 = vld [vmem:[%s3166_s2 + $0x140] sm:$0xff]   ;;  %v2604_v12 = vld [vmem:[%s3166_s2 + $0x3f8] sm:$0xff]  }
   0xd   :  { %2324 = vmatpush3.bf16.msra.mxu0 %v2578_v16  ;;  %2301 = vmatprep.subr.bf16.mxu1 %v2579_v17  ;;  %v2598_v36 = vld [vmem:[%s3166_s2 + $0x108] sm:$0xff]   ;;  %v2601_v39 = vld [vmem:[%s3166_s2] sm:$0xff]   ;;  %v2603_v14 = vld [vmem:[%s3166_s2 + $0x2f8] sm:$0xff]  }
   0xe   :  { %2325 = vmatprep.subr.bf16.mxu0 %v2580_v18  ;;  %v2602_v40 = vld [vmem:[%s3166_s2 + $0x100] sm:$0xff]   ;;  %v2605_v16 = vld [vmem:[%s3166_s2 + $0x2b8] sm:$0xff]   ;;  %v2607_v18 = vld [vmem:[%s3166_s2 + $0x2f0] sm:$0xff]  }
   0xf   :  { %v1980_v56 = vld [vmem:[%s3167_s3] ss:$0 sm:$0xff]  ;;  %v2034_v59 = vld [vmem:[%s3167_s3 + $0x2] ss:$0 sm:$0xff]  ;;  %v2606_v17 = vld [vmem:[%s3166_s2 + $0x3b8] sm:$0xff]  }
  0x10   :  { %2302 = vmatpush3.bf16.msra.mxu1 %v2581_v19  ;;  %v2608_v19 = vld [vmem:[%s3166_s2 + $0x3f0] sm:$0xff]  }
  0x11   :  { %2326 = vmatpush3.bf16.msra.mxu0 %v2582_v20  ;;  %2303 = vmatprep.subr.bf16.mxu1 %v2583_v21  ;;  %v2609_v20 = vld [vmem:[%s3166_s2 + $0x2b0] sm:$0xff]  }
  0x12   :  { %2327 = vmatprep.subr.bf16.mxu0 %v2584_v22  ;;  %v2610_v21 = vld [vmem:[%s3166_s2 + $0x3b0] sm:$0xff]   ;;  %v2611_v22 = vld [vmem:[%s3166_s2 + $0x2e8] sm:$0xff]  }
  0x14   :  { %2304 = vmatpush3.bf16.msra.mxu1 %v2585_v23  ;;  %v2612_v23 = vld [vmem:[%s3166_s2 + $0x3e8] sm:$0xff]  }
  0x15   :  { %2328 = vmatpush3.bf16.msra.mxu0 %v2586_v24  ;;  %2305 = vmatprep.subr.bf16.mxu1 %v2587_v25  ;;  %v2613_v24 = vld [vmem:[%s3166_s2 + $0x2a8] sm:$0xff]  }
  0x16   :  { %2329 = vmatprep.subr.bf16.mxu0 %v2588_v26  ;;  %v2614_v25 = vld [vmem:[%s3166_s2 + $0x3a8] sm:$0xff]   ;;  %v2615_v26 = vld [vmem:[%s3166_s2 + $0x2e0] sm:$0xff]  }
  0x18   :  { %2306 = vmatpush3.bf16.msra.mxu1 %v2589_v27  ;;  %v2616_v27 = vld [vmem:[%s3166_s2 + $0x3e0] sm:$0xff]  }
  0x19   :  { %2330 = vmatpush3.bf16.msra.mxu0 %v2590_v28  ;;  %2307 = vmatprep.subr.bf16.mxu1 %v2591_v29  ;;  %v2617_v28 = vld [vmem:[%s3166_s2 + $0x2a0] sm:$0xff]  }
  0x1a   :  { %2331 = vmatprep.subr.bf16.mxu0 %v2592_v30  ;;  %v2618_v29 = vld [vmem:[%s3166_s2 + $0x3a0] sm:$0xff]   ;;  %v2619_v30 = vld [vmem:[%s3166_s2 + $0x2d8] sm:$0xff]  }
  0x1c   :  { %2308 = vmatpush3.bf16.msra.mxu1 %v2593_v31  ;;  %v2620_v31 = vld [vmem:[%s3166_s2 + $0x3d8] sm:$0xff]  }
  0x1d   :  { %2332 = vmatpush3.bf16.msra.mxu0 %v2594_v32  ;;  %2309 = vmatprep.subr.bf16.mxu1 %v2595_v33  ;;  %v2621_v32 = vld [vmem:[%s3166_s2 + $0x298] sm:$0xff]  }
  0x1e   :  { %2333 = vmatprep.subr.bf16.mxu0 %v2596_v34  ;;  %v2622_v33 = vld [vmem:[%s3166_s2 + $0x398] sm:$0xff]   ;;  %v2623_v34 = vld [vmem:[%s3166_s2 + $0x2d0] sm:$0xff]  }
  0x20   :  { %2310 = vmatpush3.bf16.msra.mxu1 %v2597_v35  ;;  %v2624_v35 = vld [vmem:[%s3166_s2 + $0x3d0] sm:$0xff]  }
  0x21   :  { %2334 = vmatpush3.bf16.msra.mxu0 %v2598_v36  ;;  %2311 = vmatprep.subr.bf16.mxu1 %v2599_v37  ;;  %v2625_v36 = vld [vmem:[%s3166_s2 + $0x290] sm:$0xff]  }
  0x22   :  { %2335 = vmatprep.subr.bf16.mxu0 %v2600_v38  ;;  %v2626_v37 = vld [vmem:[%s3166_s2 + $0x390] sm:$0xff]   ;;  %v2627_v38 = vld [vmem:[%s3166_s2 + $0x2c8] sm:$0xff]  }
  0x24   :  { %2312 = vmatpush3.bf16.msra.mxu1 %v2601_v39  ;;  %v2628_v39 = vld [vmem:[%s3166_s2 + $0x3c8] sm:$0xff]  }
  0x25   :  { %2336 = vmatpush3.bf16.msra.mxu0 %v2602_v40  ;;  %2487 = vmatprep.subr.bf16.mxu1 %v2673_v0  ;;  %v2629_v40 = vld [vmem:[%s3166_s2 + $0x288] sm:$0xff]  }
  0x26   :  { %2493 = vmatprep.subr.bf16.mxu0 %v2673_v0 }
  0xc7   :  { %v76_v41 = vpop.f32.mrf.mxu1 }
  0xc8   :  { %v307_v42 = vpop.f32.mrf.mxu0 }
  0xc9   :  { %v2479_v43 = vpop.f32.mrf.mxu1 }
  0xca   :  { %v2485_v44 = vpop.f32.mrf.mxu0  ;;  %v2632_v43 = vld [vmem:[%s3166_s2 + $0x3c0] sm:$0xff]  }
  0xcb   :  { %v79_v45 = vpop.f32.mrf.mxu1  ;;  %v2633_v44 = vld [vmem:[%s3166_s2 + $0x280] sm:$0xff]  }
  0xcc   :  { %v83_v46 = vpack.c.bf16 %v79_v45, %v76_v41  ;;  %v310_v47 = vpop.f32.mrf.mxu0  ;;  %v2630_v41 = vld [vmem:[%s3166_s2 + $0x388] sm:$0xff]   ;;  %v2634_v45 = vld [vmem:[%s3166_s2 + $0x380] sm:$0xff]  }
  0xcd   :  { %v314_v48 = vpack.c.bf16 %v310_v47, %v307_v42  ;;  %v2480_v49 = vpop.f32.mrf.mxu1  ;;  %v2631_v42 = vld [vmem:[%s3166_s2 + $0x2c0] sm:$0xff]  }
  0xce   :  { %v2486_v50 = vpop.f32.mrf.mxu0  ;;  %252 = vmatmul.mubr.bf16.vlgmr.msra.gmra.mxu1 %v83_v46 }
  0xcf   :  { %485 = vmatmul.mubr.bf16.vlgmr.msra.gmra.mxu0 %v314_v48  ;;  %2489 = vmatprep.mubr.msk.bf16.mxu1 %vm2674_vm0, %v2673_v0 }
  0xd0   :  { %2495 = vmatprep.mubr.msk.bf16.mxu0 %vm2674_vm0, %v2673_v0 }
 0x18e   :  { %v2313_v51 = vpop.f32.mrf.mxu1 }
 0x18f   :  { %v2337_v52 = vpop.f32.mrf.mxu0 }
 0x190   :  { %v2314_v53 = vpop.f32.mrf.mxu1 }
 0x191   :  { %v2315_v54 = vadd.f32 %v2314_v53, %v2313_v51  ;;  %v2338_v55 = vpop.f32.mrf.mxu0 }
 0x192   :  { %v2339_v57 = vadd.f32 %v2338_v55, %v2337_v52  ;;  %v2316_v58 = vpop.f32.mrf.mxu1 }
 0x193   :  { %v2340_v60 = vpop.f32.mrf.mxu0  ;;  %v254_v62 = vadd.f32 %v2315_v54, %v1980_v56 }
 0x194   :  { %v2317_v61 = vpop.f32.mrf.mxu1  ;;  %v487_v2 = vadd.f32 %v2339_v57, %v2034_v59 }
 0x195   :  { %v2318_v63 = vadd.f32 %v2317_v61, %v2316_v58  ;;  %v2341_v1 = vpop.f32.mrf.mxu0  ;;  %v260_v6 = vmax.f32 %v254_v62, 0.0  ;;  %v2136_v62 = vld [vmem:[%s3167_s3 + $0x7] ss:$0 sm:$0xff] }
 0x196   :  { %v2342_v3 = vadd.f32 %v2341_v1, %v2340_v60  ;;  %v493_v10 = vmax.f32 %v487_v2, 0.0  ;;  %v2085_v1 = vld [vmem:[%s3167_s3 + $0x5] ss:$0 sm:$0xff] }
 0x197   :  { %v257_v4 = vadd.f32 %v2318_v63, %v1980_v56 }
 0x198   :  { %v490_v5 = vadd.f32 %v2342_v3, %v2034_v59 }
 0x199   :  { %v261_v9 = vmax.f32 %v257_v4, 0.0 }
 0x19a   :  { %v494_v11 = vmax.f32 %v490_v5, 0.0 }
 0x19b   :  { %v495_v13 = vpack.c.bf16 %v261_v9, %v260_v6 }
 0x19c   :  { %v496_v15 = vpack.c.bf16 %v494_v11, %v493_v10 }
 0x19d   :  { %2494 = vmatpush3.bf16.msra.mxu0 %v495_v13 }
 0x19e   :  { %2488 = vmatpush3.bf16.msra.mxu1 %v496_v15  ;;  %2369 = vmatprep.subr.bf16.mxu0 %v2604_v12 }
 0x19f   :  { %2345 = vmatprep.subr.bf16.mxu1 %v2603_v14 }
 0x1a0   :  { %2496 = vmatmul.mubr.msk.bf16.vlgmr.msra.gmra.mxu0 %vm38_vm1, %v2736_v8 }
 0x1a1   :  { %2490 = vmatmul.mubr.msk.bf16.vlgmr.msra.gmra.mxu1 %vm38_vm1, %v2731_v7  ;;  %930 = vmatprep.mubr.bf16.mxu0 %v496_v15 }
 0x1a2   :  { %708 = vmatprep.mubr.bf16.mxu1 %v495_v13  ;;  %2346 = vmatpush3.bf16.msra.mxu1 %v2605_v16  ;;  %v2635_v16 = vld [vmem:[%s3166_s2 + $0x578] sm:$0xff]  }
 0x1a3   :  { %2370 = vmatpush3.bf16.msra.mxu0 %v2606_v17  ;;  %2347 = vmatprep.subr.bf16.mxu1 %v2607_v18  ;;  %v2636_v18 = vld [vmem:[%s3166_s2 + $0x678] sm:$0xff]  }
 0x1a4   :  { %2371 = vmatprep.subr.bf16.mxu0 %v2608_v19 }
 0x1a6   :  { %2348 = vmatpush3.bf16.msra.mxu1 %v2609_v20  ;;  %v2637_v20 = vld [vmem:[%s3166_s2 + $0x538] sm:$0xff]  }
 0x1a7   :  { %2372 = vmatpush3.bf16.msra.mxu0 %v2610_v21  ;;  %2349 = vmatprep.subr.bf16.mxu1 %v2611_v22  ;;  %v2638_v21 = vld [vmem:[%s3166_s2 + $0x638] sm:$0xff]   ;;  %v2639_v22 = vld [vmem:[%s3166_s2 + $0x570] sm:$0xff]  }
 0x1a8   :  { %2373 = vmatprep.subr.bf16.mxu0 %v2612_v23  ;;  %v2640_v23 = vld [vmem:[%s3166_s2 + $0x670] sm:$0xff]  }
 0x1aa   :  { %2350 = vmatpush3.bf16.msra.mxu1 %v2613_v24  ;;  %v2641_v24 = vld [vmem:[%s3166_s2 + $0x530] sm:$0xff]  }
 0x1ab   :  { %2374 = vmatpush3.bf16.msra.mxu0 %v2614_v25  ;;  %2351 = vmatprep.subr.bf16.mxu1 %v2615_v26  ;;  %v2643_v25 = vld [vmem:[%s3166_s2 + $0x568] sm:$0xff]  }
 0x1ac   :  { %2375 = vmatprep.subr.bf16.mxu0 %v2616_v27  ;;  %v2645_v26 = vld [vmem:[%s3166_s2 + $0x528] sm:$0xff]  }
 0x1ad   :  { %v2646_v27 = vld [vmem:[%s3166_s2 + $0x628] sm:$0xff]  }
 0x1ae   :  { %2352 = vmatpush3.bf16.msra.mxu1 %v2617_v28  ;;  %v2647_v28 = vld [vmem:[%s3166_s2 + $0x560] sm:$0xff]  }
 0x1af   :  { %2376 = vmatpush3.bf16.msra.mxu0 %v2618_v29  ;;  %2353 = vmatprep.subr.bf16.mxu1 %v2619_v30  ;;  %v2648_v29 = vld [vmem:[%s3166_s2 + $0x660] sm:$0xff]  }
 0x1b0   :  { %2377 = vmatprep.subr.bf16.mxu0 %v2620_v31  ;;  %v2649_v30 = vld [vmem:[%s3166_s2 + $0x520] sm:$0xff]  }
 0x1b1   :  { %v2650_v31 = vld [vmem:[%s3166_s2 + $0x620] sm:$0xff]  }
 0x1b2   :  { %2354 = vmatpush3.bf16.msra.mxu1 %v2621_v32  ;;  %v2651_v32 = vld [vmem:[%s3166_s2 + $0x558] sm:$0xff]  }
 0x1b3   :  { %2378 = vmatpush3.bf16.msra.mxu0 %v2622_v33  ;;  %2355 = vmatprep.subr.bf16.mxu1 %v2623_v34  ;;  %v2652_v33 = vld [vmem:[%s3166_s2 + $0x658] sm:$0xff]  }
 0x1b4   :  { %2379 = vmatprep.subr.bf16.mxu0 %v2624_v35  ;;  %v2653_v34 = vld [vmem:[%s3166_s2 + $0x518] sm:$0xff]  }
 0x1b5   :  { %v2654_v35 = vld [vmem:[%s3166_s2 + $0x618] sm:$0xff]  }
 0x1b6   :  { %2356 = vmatpush3.bf16.msra.mxu1 %v2625_v36  ;;  %v2655_v36 = vld [vmem:[%s3166_s2 + $0x550] sm:$0xff]  }
 0x1b7   :  { %2380 = vmatpush3.bf16.msra.mxu0 %v2626_v37  ;;  %2357 = vmatprep.subr.bf16.mxu1 %v2627_v38  ;;  %v2656_v37 = vld [vmem:[%s3166_s2 + $0x650] sm:$0xff]  }
 0x1b8   :  { %2381 = vmatprep.subr.bf16.mxu0 %v2628_v39  ;;  %v2657_v38 = vld [vmem:[%s3166_s2 + $0x510] sm:$0xff]  }
 0x1b9   :  { %v2658_v39 = vld [vmem:[%s3166_s2 + $0x610] sm:$0xff]  }
 0x1ba   :  { %2358 = vmatpush3.bf16.msra.mxu1 %v2629_v40  ;;  %v2659_v40 = vld [vmem:[%s3166_s2 + $0x548] sm:$0xff]  }
 0x1bb   :  { %2382 = vmatpush3.bf16.msra.mxu0 %v2630_v41  ;;  %2359 = vmatprep.subr.bf16.mxu1 %v2631_v42  ;;  %v2660_v41 = vld [vmem:[%s3166_s2 + $0x648] sm:$0xff]  }
 0x1bc   :  { %2383 = vmatprep.subr.bf16.mxu0 %v2632_v43  ;;  %v2661_v42 = vld [vmem:[%s3166_s2 + $0x508] sm:$0xff]  }
 0x1bd   :  { %v2662_v43 = vld [vmem:[%s3166_s2 + $0x608] sm:$0xff]  }
 0x1be   :  { %2360 = vmatpush3.bf16.msra.mxu1 %v2633_v44  ;;  %v2663_v44 = vld [vmem:[%s3166_s2 + $0x540] sm:$0xff]  }
 0x1bf   :  { %2384 = vmatpush3.bf16.msra.mxu0 %v2634_v45  ;;  %2499 = vmatprep.subr.bf16.mxu1 %v2673_v0  ;;  %v2664_v45 = vld [vmem:[%s3166_s2 + $0x640] sm:$0xff]  }
 0x1c0   :  { %2505 = vmatprep.subr.bf16.mxu0 %v2673_v0 }
 0x260   :  { %v753_v46 = vpop.f32.mrf.mxu0 }
 0x261   :  { %v531_v47 = vpop.f32.mrf.mxu1 }
 0x262   :  { %v2497_v48 = vpop.f32.mrf.mxu0 }
 0x263   :  { %v2491_v49 = vpop.f32.mrf.mxu1 }
 0x264   :  { %v756_v50 = vpop.f32.mrf.mxu0 }
 0x265   :  { %v534_v51 = vpop.f32.mrf.mxu1  ;;  %v760_v52 = vpack.c.bf16 %v756_v50, %v753_v46  ;;  %v2665_v46 = vld [vmem:[%s3166_s2 + $0x500] sm:$0xff]  }
 0x266   :  { %v538_v53 = vpack.c.bf16 %v534_v51, %v531_v47  ;;  %v2498_v54 = vpop.f32.mrf.mxu0  ;;  %v2666_v47 = vld [vmem:[%s3166_s2 + $0x600] sm:$0xff]  }
 0x267   :  { %v2492_v55 = vpop.f32.mrf.mxu1  ;;  %931 = vmatmul.mubr.bf16.vlgmr.msra.gmra.mxu0 %v760_v52 }
 0x268   :  { %709 = vmatmul.mubr.bf16.vlgmr.msra.gmra.mxu1 %v538_v53  ;;  %2507 = vmatprep.mubr.msk.bf16.mxu0 %vm2674_vm0, %v2673_v0 }
 0x269   :  { %2501 = vmatprep.mubr.msk.bf16.mxu1 %vm2674_vm0, %v2673_v0 }
 0x327   :  { %v2385_v56 = vpop.f32.mrf.mxu0 }
 0x328   :  { %v2361_v57 = vpop.f32.mrf.mxu1 }
 0x329   :  { %v2386_v58 = vpop.f32.mrf.mxu0 }
 0x32a   :  { %v2362_v59 = vpop.f32.mrf.mxu1  ;;  %v2387_v60 = vadd.f32 %v2386_v58, %v2385_v56 }
 0x32b   :  { %v2363_v61 = vadd.f32 %v2362_v59, %v2361_v57  ;;  %v2388_v63 = vpop.f32.mrf.mxu0 }
 0x32c   :  { %v2364_v2 = vpop.f32.mrf.mxu1  ;;  %v933_v4 = vadd.f32 %v2387_v60, %v2136_v62 }
 0x32d   :  { %v2389_v3 = vpop.f32.mrf.mxu0  ;;  %v711_v6 = vadd.f32 %v2363_v61, %v2085_v1  ;;  %v2187_v61 = vld [vmem:[%s3167_s3 + $0xa] ss:$0 sm:$0xff] }
 0x32e   :  { %v2365_v5 = vpop.f32.mrf.mxu1  ;;  %v2390_v0 = vadd.f32 %v2389_v3, %v2388_v63  ;;  %v939_v12 = vmax.f32 %v933_v4, 0.0  ;;  %v2292_v63 = vld [vmem:[%s3169_s5] sm:$0xff]   ;;  %v2238_v3 = vld [vmem:[%s3167_s3 + $0xc] ss:$0 sm:$0xff] }
 0x32f   :  { %v2366_v9 = vadd.f32 %v2365_v5, %v2364_v2  ;;  %v717_v14 = vmax.f32 %v711_v6, 0.0  ;;  %v2294_v5 = vunpack.c.h.bf16 %v2292_v63 }
 0x330   :  { %v936_v10 = vadd.f32 %v2390_v0, %v2136_v62  ;;  %v2288_v62 = vld [vmem:[%s3168_s4] sm:$0xff]  }
 0x331   :  { %v714_v11 = vadd.f32 %v2366_v9, %v2085_v1  ;;  %v2290_v4 = vunpack.c.h.bf16 %v2288_v62 }
 0x332   :  { %v940_v13 = vmax.f32 %v936_v10, 0.0 }
 0x333   :  { %v718_v15 = vmax.f32 %v714_v11, 0.0  ;;  %v2289_v11 = vunpack.c.l.bf16 %v2288_v62 }
 0x334   :  { %v942_v17 = vpack.c.bf16 %v940_v13, %v939_v12  ;;  %v2293_v12 = vunpack.c.l.bf16 %v2292_v63 }
 0x335   :  { %v941_v19 = vpack.c.bf16 %v718_v15, %v717_v14 }
 0x336   :  { %2500 = vmatpush3.bf16.msra.mxu1 %v942_v17 }
 0x337   :  { %2506 = vmatpush3.bf16.msra.mxu0 %v941_v19  ;;  %2393 = vmatprep.subr.bf16.mxu1 %v2635_v16 }
 0x338   :  { %2417 = vmatprep.subr.bf16.mxu0 %v2636_v18 }
 0x339   :  { %2502 = vmatmul.mubr.msk.bf16.vlgmr.msra.gmra.mxu1 %vm38_vm1, %v2731_v7  ;;  %v2642_v7 = vld [vmem:[%s3166_s2 + $0x630] sm:$0xff]  }
 0x33a   :  { %2508 = vmatmul.mubr.msk.bf16.vlgmr.msra.gmra.mxu0 %vm38_vm1, %v2736_v8  ;;  %1154 = vmatprep.mubr.bf16.mxu1 %v941_v19  ;;  %v2644_v8 = vld [vmem:[%s3166_s2 + $0x668] sm:$0xff]  }
 0x33b   :  { %1374 = vmatprep.mubr.bf16.mxu0 %v942_v17  ;;  %2394 = vmatpush3.bf16.msra.mxu1 %v2637_v20 }
 0x33c   :  { %2418 = vmatpush3.bf16.msra.mxu0 %v2638_v21  ;;  %2395 = vmatprep.subr.bf16.mxu1 %v2639_v22 }
 0x33d   :  { %2419 = vmatprep.subr.bf16.mxu0 %v2640_v23 }
 0x33f   :  { %2396 = vmatpush3.bf16.msra.mxu1 %v2641_v24 }
 0x340   :  { %2420 = vmatpush3.bf16.msra.mxu0 %v2642_v7  ;;  %2397 = vmatprep.subr.bf16.mxu1 %v2643_v25 }
 0x341   :  { %2421 = vmatprep.subr.bf16.mxu0 %v2644_v8 }
 0x343   :  { %2398 = vmatpush3.bf16.msra.mxu1 %v2645_v26 }
 0x344   :  { %2422 = vmatpush3.bf16.msra.mxu0 %v2646_v27  ;;  %2399 = vmatprep.subr.bf16.mxu1 %v2647_v28 }
 0x345   :  { %2423 = vmatprep.subr.bf16.mxu0 %v2648_v29 }
 0x347   :  { %2400 = vmatpush3.bf16.msra.mxu1 %v2649_v30 }
 0x348   :  { %2424 = vmatpush3.bf16.msra.mxu0 %v2650_v31  ;;  %2401 = vmatprep.subr.bf16.mxu1 %v2651_v32 }
 0x349   :  { %2425 = vmatprep.subr.bf16.mxu0 %v2652_v33 }
 0x34b   :  { %2402 = vmatpush3.bf16.msra.mxu1 %v2653_v34 }
 0x34c   :  { %2426 = vmatpush3.bf16.msra.mxu0 %v2654_v35  ;;  %2403 = vmatprep.subr.bf16.mxu1 %v2655_v36 }
 0x34d   :  { %2427 = vmatprep.subr.bf16.mxu0 %v2656_v37 }
 0x34f   :  { %2404 = vmatpush3.bf16.msra.mxu1 %v2657_v38 }
 0x350   :  { %2428 = vmatpush3.bf16.msra.mxu0 %v2658_v39  ;;  %2405 = vmatprep.subr.bf16.mxu1 %v2659_v40 }
 0x351   :  { %2429 = vmatprep.subr.bf16.mxu0 %v2660_v41 }
 0x353   :  { %2406 = vmatpush3.bf16.msra.mxu1 %v2661_v42 }
 0x354   :  { %2430 = vmatpush3.bf16.msra.mxu0 %v2662_v43  ;;  %2407 = vmatprep.subr.bf16.mxu1 %v2663_v44 }
 0x355   :  { %2431 = vmatprep.subr.bf16.mxu0 %v2664_v45 }
 0x357   :  { %2408 = vmatpush3.bf16.msra.mxu1 %v2665_v46 }
 0x358   :  { %2432 = vmatpush3.bf16.msra.mxu0 %v2666_v47  ;;  %2511 = vmatprep.subr.mxu1 %v2290_v4 }
 0x359   :  { %2539 = vmatprep.subr.mxu0 %v2294_v5 }
 0x3f9   :  { %v977_v48 = vpop.f32.mrf.mxu1 }
 0x3fa   :  { %v1197_v49 = vpop.f32.mrf.mxu0 }
 0x3fb   :  { %v2503_v50 = vpop.f32.mrf.mxu1 }
 0x3fc   :  { %v2509_v51 = vpop.f32.mrf.mxu0 }
 0x3fd   :  { %v980_v52 = vpop.f32.mrf.mxu1 }
 0x3fe   :  { %v984_v53 = vpack.c.bf16 %v980_v52, %v977_v48  ;;  %v1200_v54 = vpop.f32.mrf.mxu0 }
 0x3ff   :  { %v1204_v55 = vpack.c.bf16 %v1200_v54, %v1197_v49  ;;  %v2504_v56 = vpop.f32.mrf.mxu1 }
 0x400   :  { %v2510_v57 = vpop.f32.mrf.mxu0  ;;  %1155 = vmatmul.mubr.bf16.vlgmr.msra.gmra.mxu1 %v984_v53 }
 0x401   :  { %1375 = vmatmul.mubr.bf16.vlgmr.msra.gmra.mxu0 %v1204_v55  ;;  %2512 = vmatpush3.msra.mxu1 %v2290_v4 }
 0x402   :  { %2540 = vmatpush3.msra.mxu0 %v2294_v5  ;;  %2513 = vmatprep.subr.mxu1 %v2289_v11 }
 0x403   :  { %2541 = vmatprep.subr.mxu0 %v2293_v12  ;;  %2514 = vmatpush3.msra.mxu1 %v2289_v11 }
 0x404   :  { %2542 = vmatpush3.msra.mxu0 %v2293_v12 }
 0x4c0   :  { %v2409_v58 = vpop.f32.mrf.mxu1 }
 0x4c1   :  { %v2433_v59 = vpop.f32.mrf.mxu0 }
 0x4c2   :  { %v2410_v60 = vpop.f32.mrf.mxu1 }
 0x4c3   :  { %v2411_v1 = vadd.f32 %v2410_v60, %v2409_v58  ;;  %v2434_v2 = vpop.f32.mrf.mxu0 }
 0x4c4   :  { %v2435_v0 = vadd.f32 %v2434_v2, %v2433_v59  ;;  %v2412_v6 = vpop.f32.mrf.mxu1 }
 0x4c5   :  { %v2436_v9 = vpop.f32.mrf.mxu0  ;;  %v1157_v10 = vadd.f32 %v2411_v1, %v2187_v61 }
 0x4c6   :  { %v2413_v13 = vpop.f32.mrf.mxu1  ;;  %v1377_v14 = vadd.f32 %v2435_v0, %v2238_v3 }
 0x4c7   :  { %v2414_v15 = vadd.f32 %v2413_v13, %v2412_v6  ;;  %v2437_v16 = vpop.f32.mrf.mxu0  ;;  %1616 = vxpose.xlu1.b32.start [1/2] (short) %v1157_v10, 128 }
 0x4c8   :  { %v2438_v17 = vadd.f32 %v2437_v16, %v2436_v9  ;;  %1391 = vxpose.xlu0.b32.start [1/2] (short) %v1377_v14, 128 }
 0x4c9   :  { %v1160_v18 = vadd.f32 %v2414_v15, %v2187_v61 }
 0x4ca   :  { %v1380_v19 = vadd.f32 %v2438_v17, %v2238_v3 }
 0x4cb   :  { %1617 = vxpose.xlu1.b32.end [2/2] (short) %v1160_v18, 128 }
 0x4cc   :  { %1392 = vxpose.xlu0.b32.end [2/2] (short) %v1380_v19, 128 }
 0x543   :  { %v1632_v20 = vpop.trf.xlu1 }
 0x544   :  { %v1407_v21 = vpop.trf.xlu0  ;;  %2543 = vmatprep.mubr.msk.f32.mxu0 %vm38_vm1, %v1632_v20 }
 0x545   :  { %2515 = vmatprep.mubr.msk.f32.mxu1 %vm38_vm1, %v1407_v21 }
 0x547   :  { %v1633_v22 = vpop.trf.xlu1 }
 0x548   :  { %v1408_v23 = vpop.trf.xlu0  ;;  %2544 = vmatmul.mubr.msk.f32.vlgmr.msra.gmra.mxu0 %vm38_vm1, %v1633_v22 }
 0x549   :  { %2516 = vmatmul.mubr.msk.f32.vlgmr.msra.gmra.mxu1 %vm38_vm1, %v1408_v23 }
 0x54b   :  { %v1634_v24 = vpop.trf.xlu1 }
 0x54c   :  { %v1409_v7 = vpop.trf.xlu0  ;;  %2546 = vmatprep.mubr.msk.f32.mxu0 %vm38_vm1, %v1634_v24 }
 0x54d   :  { %2518 = vmatprep.mubr.msk.f32.mxu1 %vm38_vm1, %v1409_v7 }
 0x54f   :  { %v1635_v25 = vpop.trf.xlu1 }
 0x550   :  { %v1410_v8 = vpop.trf.xlu0  ;;  %2547 = vmatmul.mubr.msk.f32.gmra.mxu0 %vm38_vm1, %v1635_v25 }
 0x551   :  { %2519 = vmatmul.mubr.msk.f32.gmra.mxu1 %vm38_vm1, %v1410_v8 }
 0x553   :  { %v1636_v26 = vpop.trf.xlu1 }
 0x554   :  { %v1411_v27 = vpop.trf.xlu0  ;;  %2549 = vmatprep.mubr.msk.f32.mxu0 %vm38_vm1, %v1636_v26 }
 0x555   :  { %2521 = vmatprep.mubr.msk.f32.mxu1 %vm38_vm1, %v1411_v27 }
 0x557   :  { %v1637_v28 = vpop.trf.xlu1 }
 0x558   :  { %v1412_v29 = vpop.trf.xlu0  ;;  %2550 = vmatmul.mubr.msk.f32.gmra.mxu0 %vm38_vm1, %v1637_v28 }
 0x559   :  { %2522 = vmatmul.mubr.msk.f32.gmra.mxu1 %vm38_vm1, %v1412_v29 }
 0x55b   :  { %v1638_v30 = vpop.trf.xlu1 }
 0x55c   :  { %v1413_v31 = vpop.trf.xlu0  ;;  %2552 = vmatprep.mubr.msk.f32.mxu0 %vm38_vm1, %v1638_v30 }
 0x55d   :  { %2524 = vmatprep.mubr.msk.f32.mxu1 %vm38_vm1, %v1413_v31 }
 0x55f   :  { %v1639_v32 = vpop.trf.xlu1 }
 0x560   :  { %v1414_v33 = vpop.trf.xlu0  ;;  %2553 = vmatmul.mubr.msk.f32.gmra.mxu0 %vm38_vm1, %v1639_v32 }
 0x561   :  { %2525 = vmatmul.mubr.msk.f32.gmra.mxu1 %vm38_vm1, %v1414_v33 }
 0x563   :  { %v1640_v34 = vpop.trf.xlu1 }
 0x564   :  { %v1415_v35 = vpop.trf.xlu0  ;;  %2555 = vmatprep.mubr.msk.f32.mxu0 %vm38_vm1, %v1640_v34 }
 0x565   :  { %2527 = vmatprep.mubr.msk.f32.mxu1 %vm38_vm1, %v1415_v35 }
 0x567   :  { %v1641_v36 = vpop.trf.xlu1 }
 0x568   :  { %v1416_v37 = vpop.trf.xlu0  ;;  %2556 = vmatmul.mubr.msk.f32.gmra.mxu0 %vm38_vm1, %v1641_v36 }
 0x569   :  { %2528 = vmatmul.mubr.msk.f32.gmra.mxu1 %vm38_vm1, %v1416_v37 }
 0x56b   :  { %v1642_v38 = vpop.trf.xlu1 }
 0x56c   :  { %v1417_v39 = vpop.trf.xlu0  ;;  %2558 = vmatprep.mubr.msk.f32.mxu0 %vm38_vm1, %v1642_v38 }
 0x56d   :  { %2530 = vmatprep.mubr.msk.f32.mxu1 %vm38_vm1, %v1417_v39 }
 0x56f   :  { %v1643_v40 = vpop.trf.xlu1 }
 0x570   :  { %v1418_v41 = vpop.trf.xlu0  ;;  %2559 = vmatmul.mubr.msk.f32.gmra.mxu0 %vm38_vm1, %v1643_v40 }
 0x571   :  { %2531 = vmatmul.mubr.msk.f32.gmra.mxu1 %vm38_vm1, %v1418_v41 }
 0x573   :  { %v1644_v42 = vpop.trf.xlu1 }
 0x574   :  { %v1419_v43 = vpop.trf.xlu0  ;;  %2561 = vmatprep.mubr.msk.f32.mxu0 %vm38_vm1, %v1644_v42 }
 0x575   :  { %2533 = vmatprep.mubr.msk.f32.mxu1 %vm38_vm1, %v1419_v43 }
 0x577   :  { %v1645_v44 = vpop.trf.xlu1 }
 0x578   :  { %v1420_v45 = vpop.trf.xlu0  ;;  %2562 = vmatmul.mubr.msk.f32.gmra.mxu0 %vm38_vm1, %v1645_v44 }
 0x579   :  { %2534 = vmatmul.mubr.msk.f32.gmra.mxu1 %vm38_vm1, %v1420_v45 }
 0x57b   :  { %v1646_v46 = vpop.trf.xlu1 }
 0x57c   :  { %v1421_v47 = vpop.trf.xlu0  ;;  %2564 = vmatprep.mubr.msk.f32.mxu0 %vm38_vm1, %v1646_v46 }
 0x57d   :  { %2536 = vmatprep.mubr.msk.f32.mxu1 %vm38_vm1, %v1421_v47 }
 0x57f   :  { %v1647_v48 = vpop.trf.xlu1 }
 0x580   :  { %v1422_v49 = vpop.trf.xlu0  ;;  %2565 = vmatmul.mubr.msk.f32.gmra.mxu0 %vm38_vm1, %v1647_v48 }
 0x581   :  { %2537 = vmatmul.mubr.msk.f32.gmra.mxu1 %vm38_vm1, %v1422_v49 }
 0x608   :  { %v2545_v50 = vpop.f32.mrf.mxu0 }
 0x609   :  { %v2517_v51 = vpop.f32.mrf.mxu1  ;;  %v1923_v61 = vmul.f32 %v2545_v50, %v2545_v50 }
 0x60a   :  { %v1762_v52 = vpop.f32.mrf.mxu0  ;;  %v1879_v1 = vmul.f32 %v2517_v51, %v2517_v51  ;;  %v1842_v44 = vmul.f32 %v2545_v50, %v2517_v51 }
 0x60b   :  { %v1537_v53 = vpop.f32.mrf.mxu1  ;;  %v1922_v57 = vmul.f32 %v1762_v52, %v1762_v52 }
 0x60c   :  { %v1878_v59 = vmul.f32 %v1537_v53, %v1537_v53  ;;  %v1841_v39 = vmul.f32 %v1762_v52, %v1537_v53 }
 0x60d   :  { %v1938_v3 = vadd.f32 %v1923_v61, %v1922_v57 }
 0x60e   :  { %v1894_v4 = vadd.f32 %v1879_v1, %v1878_v59  ;;  %v1857_v49 = vadd.f32 %v1842_v44, %v1841_v39 }
 0x610   :  { %v3106_v54 = vpop.f32.mrf.mxu0 }
 0x611   :  { %v3108_v55 = vpop.f32.mrf.mxu1  ;;  %v1925_v11 = vmul.f32 %v3106_v54, %v3106_v54 }
 0x612   :  { %v1772_v56 = vpop.f32.mrf.mxu0  ;;  %v1881_v14 = vmul.f32 %v3108_v55, %v3108_v55  ;;  %v1844_v50 = vmul.f32 %v3106_v54, %v3108_v55 }
 0x613   :  { %v1547_v58 = vpop.f32.mrf.mxu1  ;;  %v1924_v62 = vmul.f32 %v1772_v56, %v1772_v56 }
 0x614   :  { %v1880_v2 = vmul.f32 %v1547_v58, %v1547_v58  ;;  %v1843_v45 = vmul.f32 %v1772_v56, %v1547_v58 }
 0x615   :  { %v1939_v0 = vadd.f32 %v1938_v3, %v1924_v62 }
 0x616   :  { %v1895_v9 = vadd.f32 %v1894_v4, %v1880_v2  ;;  %v1858_v62 = vadd.f32 %v1857_v49, %v1843_v45 }
 0x617   :  { %v1940_v16 = vadd.f32 %v1939_v0, %v1925_v11 }
 0x618   :  { %v3110_v60 = vpop.f32.mrf.mxu0  ;;  %v1896_v17 = vadd.f32 %v1895_v9, %v1881_v14  ;;  %v1859_v9 = vadd.f32 %v1858_v62, %v1844_v50 }
 0x619   :  { %v3112_v63 = vpop.f32.mrf.mxu1  ;;  %v1927_v23 = vmul.f32 %v3110_v60, %v3110_v60 }
 0x61a   :  { %v1782_v5 = vpop.f32.mrf.mxu0  ;;  %v1883_v25 = vmul.f32 %v3112_v63, %v3112_v63  ;;  %v1846_v54 = vmul.f32 %v3110_v60, %v3112_v63 }
 0x61b   :  { %v1557_v6 = vpop.f32.mrf.mxu1  ;;  %v1926_v12 = vmul.f32 %v1782_v5, %v1782_v5 }
 0x61c   :  { %v1882_v15 = vmul.f32 %v1557_v6, %v1557_v6  ;;  %v1845_v51 = vmul.f32 %v1782_v5, %v1557_v6 }
 0x61d   :  { %v1941_v19 = vadd.f32 %v1940_v16, %v1926_v12 }
 0x61e   :  { %v1897_v21 = vadd.f32 %v1896_v17, %v1882_v15  ;;  %v1860_v15 = vadd.f32 %v1859_v9, %v1845_v51 }
 0x61f   :  { %v1942_v26 = vadd.f32 %v1941_v19, %v1927_v23 }
 0x620   :  { %v3114_v10 = vpop.f32.mrf.mxu0  ;;  %v1898_v27 = vadd.f32 %v1897_v21, %v1883_v25  ;;  %v1861_v23 = vadd.f32 %v1860_v15, %v1846_v54 }
 0x621   :  { %v3118_v13 = vpop.f32.mrf.mxu1  ;;  %v1929_v32 = vmul.f32 %v3114_v10, %v3114_v10 }
 0x622   :  { %v1792_v18 = vpop.f32.mrf.mxu0  ;;  %v1885_v34 = vmul.f32 %v3118_v13, %v3118_v13  ;;  %v1848_v60 = vmul.f32 %v3114_v10, %v3118_v13 }
 0x623   :  { %v1567_v20 = vpop.f32.mrf.mxu1  ;;  %v1928_v24 = vmul.f32 %v1792_v18, %v1792_v18 }
 0x624   :  { %v1884_v8 = vmul.f32 %v1567_v20, %v1567_v20  ;;  %v1847_v55 = vmul.f32 %v1792_v18, %v1567_v20 }
 0x625   :  { %v1943_v29 = vadd.f32 %v1942_v26, %v1928_v24 }
 0x626   :  { %v1899_v31 = vadd.f32 %v1898_v27, %v1884_v8 }
 0x627   :  { %v1944_v37 = vadd.f32 %v1943_v29, %v1929_v32  ;;  %v1862_v29 = vadd.f32 %v1861_v23, %v1847_v55 }
 0x628   :  { %v3122_v22 = vpop.f32.mrf.mxu0  ;;  %v1900_v40 = vadd.f32 %v1899_v31, %v1885_v34 }
 0x629   :  { %v3126_v7 = vpop.f32.mrf.mxu1  ;;  %v1931_v47 = vmul.f32 %v3122_v22, %v3122_v22 }
 0x62a   :  { %v1802_v28 = vpop.f32.mrf.mxu0  ;;  %v1887_v57 = vmul.f32 %v3126_v7, %v3126_v7 }
 0x62b   :  { %v1577_v30 = vpop.f32.mrf.mxu1  ;;  %v1930_v33 = vmul.f32 %v1802_v28, %v1802_v28 }
 0x62c   :  { %v1886_v35 = vmul.f32 %v1577_v30, %v1577_v30  ;;  %v1849_v63 = vmul.f32 %v1802_v28, %v1577_v30 }
 0x62d   :  { %v1945_v42 = vadd.f32 %v1944_v37, %v1930_v33  ;;  %v1863_v37 = vadd.f32 %v1862_v29, %v1848_v60 }
 0x62e   :  { %v1901_v46 = vadd.f32 %v1900_v40, %v1886_v35 }
 0x62f   :  { %v1946_v61 = vadd.f32 %v1945_v42, %v1931_v47  ;;  %v1864_v42 = vadd.f32 %v1863_v37, %v1849_v63 }
 0x630   :  { %v3134_v36 = vpop.f32.mrf.mxu0  ;;  %v1902_v1 = vadd.f32 %v1901_v46, %v1887_v57  ;;  %v1850_v46 = vmul.f32 %v3122_v22, %v3126_v7 }
 0x631   :  { %v3136_v38 = vpop.f32.mrf.mxu1  ;;  %v1933_v3 = vmul.f32 %v3134_v36, %v3134_v36 }
 0x632   :  { %v1812_v41 = vpop.f32.mrf.mxu0  ;;  %v1889_v11 = vmul.f32 %v3136_v38, %v3136_v38  ;;  %v1865_v57 = vadd.f32 %v1864_v42, %v1850_v46  ;;  %v1852_v30 = vmul.f32 %v3134_v36, %v3136_v38 }
 0x633   :  { %v1587_v43 = vpop.f32.mrf.mxu1  ;;  %v1932_v48 = vmul.f32 %v1812_v41, %v1812_v41 }
 0x634   :  { %v1888_v59 = vmul.f32 %v1587_v43, %v1587_v43  ;;  %v1851_v47 = vmul.f32 %v1812_v41, %v1587_v43 }
 0x635   :  { %v1947_v53 = vadd.f32 %v1946_v61, %v1932_v48 }
 0x636   :  { %v1903_v56 = vadd.f32 %v1902_v1, %v1888_v59  ;;  %v1866_v10 = vadd.f32 %v1865_v57, %v1851_v47 }
 0x637   :  { %v1948_v14 = vadd.f32 %v1947_v53, %v1933_v3 }
 0x638   :  { %v3142_v52 = vpop.f32.mrf.mxu0  ;;  %v1904_v16 = vadd.f32 %v1903_v56, %v1889_v11  ;;  %v1867_v50 = vadd.f32 %v1866_v10, %v1852_v30 }
 0x639   :  { %v2535_v2 = vpop.f32.mrf.mxu1  ;;  %v1935_v19 = vmul.f32 %v3142_v52, %v3142_v52 }
 0x63a   :  { %v1822_v58 = vpop.f32.mrf.mxu0  ;;  %v1891_v24 = vmul.f32 %v2535_v2, %v2535_v2  ;;  %v1854_v22 = vmul.f32 %v3142_v52, %v2535_v2 }
 0x63b   :  { %v1597_v4 = vpop.f32.mrf.mxu1  ;;  %v1934_v0 = vmul.f32 %v1822_v58, %v1822_v58 }
 0x63c   :  { %v1890_v12 = vmul.f32 %v1597_v4, %v1597_v4  ;;  %v1853_v62 = vmul.f32 %v1822_v58, %v1597_v4 }
 0x63d   :  { %v1949_v17 = vadd.f32 %v1948_v14, %v1934_v0 }
 0x63e   :  { %v1905_v5 = vadd.f32 %v1904_v16, %v1890_v12  ;;  %v1868_v56 = vadd.f32 %v1867_v50, %v1853_v62 }
 0x63f   :  { %v1950_v27 = vadd.f32 %v1949_v17, %v1935_v19 }
 0x640   :  { %v2566_v6 = vpop.f32.mrf.mxu0  ;;  %v1906_v32 = vadd.f32 %v1905_v5, %v1891_v24  ;;  %v1869_v41 = vadd.f32 %v1868_v56, %v1854_v22 }
 0x641   :  { %v2538_v21 = vpop.f32.mrf.mxu1  ;;  %v1937_v33 = vmul.f32 %v2566_v6, %v2566_v6 }
 0x642   :  { %v1832_v25 = vpop.f32.mrf.mxu0  ;;  %v1893_v18 = vmul.f32 %v2538_v21, %v2538_v21  ;;  %v1856_v3 = vmul.f32 %v2566_v6, %v2538_v21 }
 0x643   :  { %v1607_v8 = vpop.f32.mrf.mxu1  ;;  %v1936_v26 = vmul.f32 %v1832_v25, %v1832_v25 }
 0x644   :  { %v1892_v31 = vmul.f32 %v1607_v8, %v1607_v8  ;;  %v1855_v7 = vmul.f32 %v1832_v25, %v1607_v8 }
 0x645   :  { %v1951_v34 = vadd.f32 %v1950_v27, %v1936_v26 }
 0x646   :  { %v1907_v20 = vadd.f32 %v1906_v32, %v1892_v31  ;;  %v1870_v43 = vadd.f32 %v1869_v41, %v1855_v7 }
 0x647   :  { %v1952_v35 = vadd.f32 %v1951_v34, %v1937_v33 }
 0x648   :  { %v1908_v39 = vadd.f32 %v1907_v20, %v1893_v18  ;;  %v1871_v0 = vadd.f32 %v1870_v43, %v1856_v3 }
 0x649   :  { %v1953_v40 = vrot.slane %v1952_v35, 4 }
 0x64a   :  { %v1909_v44 = vrot.slane %v1908_v39, 4  ;;  %v1872_v36 = vrot.slane %v1871_v0, 4 }
 0x64b   :  { %v1954_v45 = vadd.f32 %v1953_v40, %v1952_v35 }
 0x64c   :  { %v1910_v48 = vadd.f32 %v1909_v44, %v1908_v39  ;;  %v1873_v17 = vadd.f32 %v1872_v36, %v1871_v0 }
 0x64d   :  { %v1955_v49 = vrot.slane %v1954_v45, 2 }
 0x64e   :  { %v1911_v59 = vrot.slane %v1910_v48, 2  ;;  %v1874_v5 = vrot.slane %v1873_v17, 2 }
 0x64f   :  { %v1956_v61 = vadd.f32 %v1955_v49, %v1954_v45 }
 0x650   :  { %v1912_v13 = vadd.f32 %v1911_v59, %v1910_v48  ;;  %v1875_v6 = vadd.f32 %v1874_v5, %v1873_v17 }
 0x651   :  { %v1957_v28 = vrot.slane %v1956_v61, 1 }
 0x652   :  { %v1913_v1 = vrot.slane %v1912_v13, 1  ;;  %v1876_v19 = vrot.slane %v1875_v6, 1 }
 0x653   :  { %v1958_v53 = vadd.f32 %v1957_v28, %v1956_v61 }
 0x654   :  { %v1914_v51 = vadd.f32 %v1913_v1, %v1912_v13  ;;  %v1877_v21 = vadd.f32 %v1876_v19, %v1875_v6 }
 0x655   :  { %2667 = vrsqrt.f32 %v1958_v53  ;;  %vm1961_vm2 = vcmp.eq.f32.partialorder %v1958_v53, inf  ;;  %v1964_v38 = vand.u32 2147483648, %v1958_v53  ;;  %vm1963_vm4 = vcmp.eq.f32.partialorder %v1958_v53, 0.0 }
 0x656   :  { %2669 = vrsqrt.f32 %v1914_v51  ;;  %vm1917_vm3 = vcmp.eq.f32.partialorder %v1914_v51, inf  ;;  %v1920_v58 = vand.u32 2147483648, %v1914_v51  ;;  %vm1919_vm5 = vcmp.eq.f32.partialorder %v1914_v51, 0.0 }
 0x662   :  { %v2668_v9 = vpop.eup %2667 }
 0x663   :  { %v2670_v11 = vpop.eup %2669  ;;  %v1960_v12 = vmul.f32 %v2668_v9, %v1958_v53 }
 0x664   :  { %v1916_v14 = vmul.f32 %v2670_v11, %v1914_v51 }
 0x665   :  { %v1962_v4 = vsel %vm1961_vm2, %v1958_v53, %v1960_v12 }
 0x666   :  { %v1918_v15 = vsel %vm1917_vm3, %v1914_v51, %v1916_v14  ;;  %v1965_v16 = vsel %vm1963_vm4, %v1964_v38, %v1962_v4 }
 0x667   :  { %v1921_v52 = vsel %vm1919_vm5, %v1920_v58, %v1918_v15  ;;  %v1967_v2 = vmax.f32 %v1965_v16, 1e-06 }
 0x668   :  { %v1966_v54 = vmax.f32 %v1921_v52, 1e-06 }
 0x66a   :  { %v1968_v55 = vmul.f32 %v1967_v2, %v1966_v54 }
 0x66c   :  { %2671 = vrcp.f32 %v1968_v55 }
 0x679   :  { %v2672_v23 = vpop.eup %2671 }
 0x67a   :  { %v1970_v24 = vmul.f32 %v2672_v23, %v1877_v21 }
 0x67c   :  { %1971 = vst [vmem:[%s3170_s6] sm:$0xff] %v1970_v24 }

</bundles_post_ra>
